<compile_context>
chip_gen: v5e
topology: v5e:2x2
jax: 0.10.0
libtpu: 0.0.40
codegen_flags: <defaults>
</compile_context>

<pallas_src>
import jax
import jax.numpy as jnp
from jax.experimental import pallas as pl
from jax.experimental.pallas import tpu as pltpu

# ---- model hyperparameters (consistent with the PyTorch module) ----
N_OBS = 128          # forced by x[:, 0:128] in the reference forward()
N_PREV = 16          # n_previous_features
HIDDEN = 32          # options.hidden_layer_size
PREV_H = 16          # fixed 16-wide previous branch
COMB = HIDDEN + PREV_H   # 48
N_ACTIONS = 4

IN_DIM = N_OBS + N_PREV  # 144
WIDTH = 128              # lane-dense width of every hidden / output operand
BT = 16                  # batch tile (bf16 sublane tile height)

# ---- packed bf16 parameter slab layout (all row offsets multiples of 16) ----
R_W1 = 0                       # W1 [144,128]  (block-diag current/prev)
R_B1 = R_W1 + IN_DIM           # 144: b1 replicated x16 -> [16,128]
R_W2 = R_B1 + BT               # 160: W2 [128,128] (block-diag in 48x48 corner)
R_B2 = R_W2 + WIDTH            # 288: b2 replicated x16
R_WC = R_B2 + BT               # 304: Wc [128,128] (dense 48x48 corner)
R_BC = R_WC + WIDTH            # 432: bc replicated x16
R_W3 = R_BC + BT               # 448: W3 [128,128] (48x4 corner -> padded logits)
R_B3 = R_W3 + WIDTH            # 576: b3 replicated x16
SLAB_ROWS = R_B3 + BT          # 592 rows x 128 lanes x 2B ~= 148 KiB total


def dqn_kernel(x_ref, p_ref, out_ref):
    x = x_ref[...].astype(jnp.bfloat16)                    # [BT, 144] bf16

    # full-lane, 16-row-aligned static slab views (no masked loads)
    w1 = p_ref[R_W1:R_W1 + IN_DIM, :]                      # [144, 128] bf16
    b1 = p_ref[R_B1:R_B1 + BT, :].astype(jnp.float32)      # [BT, 128]  f32
    w2 = p_ref[R_W2:R_W2 + WIDTH, :]                       # [128, 128]
    b2 = p_ref[R_B2:R_B2 + BT, :].astype(jnp.float32)
    wc = p_ref[R_WC:R_WC + WIDTH, :]
    bc = p_ref[R_BC:R_BC + BT, :].astype(jnp.float32)
    w3 = p_ref[R_W3:R_W3 + WIDTH, :]
    b3 = p_ref[R_B3:R_B3 + BT, :].astype(jnp.float32)

    # layer 1: current + previous fused via block-diagonal weights
    h = jnp.maximum(jnp.dot(x, w1, preferred_element_type=jnp.float32) + b1, 0.0)
    # layer 2: both branches, block-diagonal (zeros stay zero through ReLU)
    h = jnp.maximum(
        jnp.dot(h.astype(jnp.bfloat16), w2, preferred_element_type=jnp.float32)
        + b2, 0.0)
    # combined layer (dense 48x48, identical to concat-then-linear)
    h = jnp.maximum(
        jnp.dot(h.astype(jnp.bfloat16), wc, preferred_element_type=jnp.float32)
        + bc, 0.0)
    # output layer, lane-dense padded to 128 (logits in lanes 0..3, rest zero)
    out_ref[...] = (
        jnp.dot(h.astype(jnp.bfloat16), w3, preferred_element_type=jnp.float32)
        + b3).astype(out_ref.dtype)


def init_linear(key, fan_in, fan_out):
    # PyTorch-style init: U(-1/sqrt(fan_in), 1/sqrt(fan_in)) for W and b
    kw, kb = jax.random.split(key)
    bound = 1.0 / jnp.sqrt(jnp.float32(fan_in))
    w = jax.random.uniform(kw, (fan_in, fan_out), jnp.float32, -bound, bound)
    b = jax.random.uniform(kb, (1, fan_out), jnp.float32, -bound, bound)
    return w, b


def make_params(key):
    ks = jax.random.split(key, 6)
    w1c, b1c = init_linear(ks[0], N_OBS, HIDDEN)
    w2c, b2c = init_linear(ks[1], HIDDEN, HIDDEN)
    w1p, b1p = init_linear(ks[2], N_PREV, PREV_H)
    w2p, b2p = init_linear(ks[3], PREV_H, PREV_H)
    wcb, bcb = init_linear(ks[4], COMB, COMB)
    w3, b3 = init_linear(ks[5], COMB, N_ACTIONS)
    return (w1c, b1c, w2c, b2c, w1p, b1p, w2p, b2p, wcb, bcb, w3, b3)


def pack_params(params):
    """Pack all weights/biases into one bf16 [592, 128] slab (single DMA)."""
    (w1c, b1c, w2c, b2c, w1p, b1p, w2p, b2p, wcb, bcb, w3, b3) = params

    def pad_to(m, rows, cols):
        return jnp.zeros((rows, cols), jnp.float32).at[:m.shape[0], :m.shape[1]].set(m)

    # block-diagonal fused layer-1 / layer-2 weights, widened to 128 lanes
    w1 = jnp.zeros((IN_DIM, WIDTH), jnp.float32)
    w1 = w1.at[:N_OBS, :HIDDEN].set(w1c)
    w1 = w1.at[N_OBS:, HIDDEN:COMB].set(w1p)
    b1 = pad_to(jnp.concatenate([b1c, b1p], axis=1), 1, WIDTH)

    w2 = jnp.zeros((WIDTH, WIDTH), jnp.float32)
    w2 = w2.at[:HIDDEN, :HIDDEN].set(w2c)
    w2 = w2.at[HIDDEN:COMB, HIDDEN:COMB].set(w2p)
    b2 = pad_to(jnp.concatenate([b2c, b2p], axis=1), 1, WIDTH)

    wc = pad_to(wcb, WIDTH, WIDTH)
    bc = pad_to(bcb, 1, WIDTH)
    w3p = pad_to(w3, WIDTH, WIDTH)
    b3p = pad_to(b3, 1, WIDTH)

    slab = jnp.zeros((SLAB_ROWS, WIDTH), jnp.float32)
    slab = slab.at[R_W1:R_W1 + IN_DIM, :].set(w1)
    slab = slab.at[R_B1:R_B1 + BT, :].set(jnp.tile(b1, (BT, 1)))
    slab = slab.at[R_W2:R_W2 + WIDTH, :].set(w2)
    slab = slab.at[R_B2:R_B2 + BT, :].set(jnp.tile(b2, (BT, 1)))
    slab = slab.at[R_WC:R_WC + WIDTH, :].set(wc)
    slab = slab.at[R_BC:R_BC + BT, :].set(jnp.tile(bc, (BT, 1)))
    slab = slab.at[R_W3:R_W3 + WIDTH, :].set(w3p)
    slab = slab.at[R_B3:R_B3 + BT, :].set(jnp.tile(b3p, (BT, 1)))
    return slab.astype(jnp.bfloat16)


@jax.jit
def dqn_forward(x, packed_params):
    b = x.shape[0]
    bpad = ((b + BT - 1) // BT) * BT
    xp = jnp.pad(x, ((0, bpad - b), (0, 0))) if bpad != b else x
    n_tiles = bpad // BT

    flops = 2 * bpad * (IN_DIM * WIDTH + 3 * WIDTH * WIDTH)
    bytes_accessed = xp.size * 4 + packed_params.size * 2 + bpad * WIDTH * 4
    cost = pl.CostEstimate(flops=flops, transcendentals=0,
                           bytes_accessed=bytes_accessed)

    if n_tiles == 1:
        # single batch tile: gridless call, whole problem resident in VMEM
        vmem = pl.BlockSpec(memory_space=pltpu.MemorySpace.VMEM)
        out_pad = pl.pallas_call(
            dqn_kernel,
            out_shape=jax.ShapeDtypeStruct((BT, WIDTH), jnp.float32),
            in_specs=[vmem, vmem],
            out_specs=vmem,
            cost_estimate=cost,
        )(xp, packed_params)
    else:
        # larger batches: parallel batch grid (v7x megacore splits it); the
        # slab block index is constant so it is only DMA'd once.
        out_pad = pl.pallas_call(
            dqn_kernel,
            out_shape=jax.ShapeDtypeStruct((bpad, WIDTH), jnp.float32),
            grid=(n_tiles,),
            in_specs=[pl.BlockSpec((BT, IN_DIM), lambda i: (i, 0)),
                      pl.BlockSpec((SLAB_ROWS, WIDTH), lambda i: (0, 0))],
            out_specs=pl.BlockSpec((BT, WIDTH), lambda i: (i, 0)),
            compiler_params=pltpu.CompilerParams(
                dimension_semantics=("parallel",)),
            cost_estimate=cost,
        )(xp, packed_params)
    return out_pad[:b, :N_ACTIONS]


def dqn_reference(x, params):
    (w1c, b1c, w2c, b2c, w1p, b1p, w2p, b2p, wcb, bcb, w3, b3) = params
    xc, xpv = x[:, :N_OBS], x[:, N_OBS:]
    hc = jax.nn.relu(xc @ w1c + b1c)
    hc = jax.nn.relu(hc @ w2c + b2c)
    hp = jax.nn.relu(xpv @ w1p + b1p)
    hp = jax.nn.relu(hp @ w2p + b2p)
    h = jnp.concatenate([hc, hp], axis=1)
    h = jax.nn.relu(h @ wcb + bcb)
    return h @ w3 + b3


if __name__ == "__main__":
    key = jax.random.PRNGKey(0)
    kx, kp, kx2 = jax.random.split(key, 3)
    params = make_params(kp)
    packed = pack_params(params)

    # small batch (padded to one 16-row tile -> gridless call)
    x_small = jax.random.normal(kx, (8, IN_DIM), jnp.float32)
    out_small = jax.block_until_ready(dqn_forward(x_small, packed))
    ref_small = dqn_reference(x_small, params)
    assert out_small.shape == (8, N_ACTIONS)
    # bf16 weights/activations (f32 accumulation) -> loosened tolerance
    assert jnp.allclose(out_small, ref_small, atol=3e-2, rtol=3e-2)

    # larger batch (3 tiles -> parallel batch grid path)
    x_big = jax.random.normal(kx2, (48, IN_DIM), jnp.float32)
    out_big = jax.block_until_ready(dqn_forward(x_big, packed))
    ref_big = dqn_reference(x_big, params)
    assert out_big.shape == (48, N_ACTIONS)
    assert jnp.allclose(out_big, ref_big, atol=3e-2, rtol=3e-2)

    print("KERNEL_OK")
</pallas_src>

<mosaic_0001>
module attributes {stable_mosaic.version = 11 : i64} {
  func.func @dqn_kernel(%arg0: memref<16x144xf32, #tpu.memory_space<vmem>>, %arg1: memref<592x128xbf16, #tpu.memory_space<vmem>>, %arg2: memref<16x128xf32, #tpu.memory_space<vmem>>) attributes {dimension_semantics = [], scalar_prefetch = 0 : i64, scratch_operands = 0 : i64, tpu.core_type = #tpu.core_type<tc>} {
    %c0 = arith.constant 0 : index
    %c0_0 = arith.constant 0 : index
    %0 = vector.load %arg0[%c0, %c0_0] : memref<16x144xf32, #tpu.memory_space<vmem>>, vector<16x144xf32>
    %1 = arith.truncf %0 : vector<16x144xf32> to vector<16x144xbf16>
    %c0_1 = arith.constant 0 : index
    %c0_2 = arith.constant 0 : index
    %2 = vector.load %arg1[%c0_1, %c0_2] : memref<592x128xbf16, #tpu.memory_space<vmem>>, vector<144x128xbf16>
    %c144 = arith.constant 144 : index
    %c0_3 = arith.constant 0 : index
    %3 = vector.load %arg1[%c144, %c0_3] : memref<592x128xbf16, #tpu.memory_space<vmem>>, vector<16x128xbf16>
    %4 = arith.extf %3 : vector<16x128xbf16> to vector<16x128xf32>
    %c160 = arith.constant 160 : index
    %c0_4 = arith.constant 0 : index
    %5 = vector.load %arg1[%c160, %c0_4] : memref<592x128xbf16, #tpu.memory_space<vmem>>, vector<128x128xbf16>
    %c288 = arith.constant 288 : index
    %c0_5 = arith.constant 0 : index
    %6 = vector.load %arg1[%c288, %c0_5] : memref<592x128xbf16, #tpu.memory_space<vmem>>, vector<16x128xbf16>
    %7 = arith.extf %6 : vector<16x128xbf16> to vector<16x128xf32>
    %c304 = arith.constant 304 : index
    %c0_6 = arith.constant 0 : index
    %8 = vector.load %arg1[%c304, %c0_6] : memref<592x128xbf16, #tpu.memory_space<vmem>>, vector<128x128xbf16>
    %c432 = arith.constant 432 : index
    %c0_7 = arith.constant 0 : index
    %9 = vector.load %arg1[%c432, %c0_7] : memref<592x128xbf16, #tpu.memory_space<vmem>>, vector<16x128xbf16>
    %10 = arith.extf %9 : vector<16x128xbf16> to vector<16x128xf32>
    %c448 = arith.constant 448 : index
    %c0_8 = arith.constant 0 : index
    %11 = vector.load %arg1[%c448, %c0_8] : memref<592x128xbf16, #tpu.memory_space<vmem>>, vector<128x128xbf16>
    %c576 = arith.constant 576 : index
    %c0_9 = arith.constant 0 : index
    %12 = vector.load %arg1[%c576, %c0_9] : memref<592x128xbf16, #tpu.memory_space<vmem>>, vector<16x128xbf16>
    %13 = arith.extf %12 : vector<16x128xbf16> to vector<16x128xf32>
    %cst = arith.constant dense<0.000000e+00> : vector<16x128xf32>
    %14 = tpu.matmul %1, %2, %cst {dimension_numbers = #tpu.dot_dimension_numbers<[1], [0], [0], [1], [0, 0, 1, 1], [], []>} : vector<16x144xbf16>, vector<144x128xbf16>, vector<16x128xf32> -> vector<16x128xf32>
    %15 = arith.addf %14, %4 : vector<16x128xf32>
    %cst_10 = arith.constant 0.000000e+00 : f32
    %16 = vector.broadcast %cst_10 : f32 to vector<16x128xf32>
    %17 = arith.maximumf %15, %16 : vector<16x128xf32>
    %18 = arith.truncf %17 : vector<16x128xf32> to vector<16x128xbf16>
    %cst_11 = arith.constant dense<0.000000e+00> : vector<16x128xf32>
    %19 = tpu.matmul %18, %5, %cst_11 {dimension_numbers = #tpu.dot_dimension_numbers<[1], [0], [0], [1], [0, 0, 1, 1], [], []>} : vector<16x128xbf16>, vector<128x128xbf16>, vector<16x128xf32> -> vector<16x128xf32>
    %20 = arith.addf %19, %7 : vector<16x128xf32>
    %cst_12 = arith.constant 0.000000e+00 : f32
    %21 = vector.broadcast %cst_12 : f32 to vector<16x128xf32>
    %22 = arith.maximumf %20, %21 : vector<16x128xf32>
    %23 = arith.truncf %22 : vector<16x128xf32> to vector<16x128xbf16>
    %cst_13 = arith.constant dense<0.000000e+00> : vector<16x128xf32>
    %24 = tpu.matmul %23, %8, %cst_13 {dimension_numbers = #tpu.dot_dimension_numbers<[1], [0], [0], [1], [0, 0, 1, 1], [], []>} : vector<16x128xbf16>, vector<128x128xbf16>, vector<16x128xf32> -> vector<16x128xf32>
    %25 = arith.addf %24, %10 : vector<16x128xf32>
    %cst_14 = arith.constant 0.000000e+00 : f32
    %26 = vector.broadcast %cst_14 : f32 to vector<16x128xf32>
    %27 = arith.maximumf %25, %26 : vector<16x128xf32>
    %28 = arith.truncf %27 : vector<16x128xf32> to vector<16x128xbf16>
    %cst_15 = arith.constant dense<0.000000e+00> : vector<16x128xf32>
    %29 = tpu.matmul %28, %11, %cst_15 {dimension_numbers = #tpu.dot_dimension_numbers<[1], [0], [0], [1], [0, 0, 1, 1], [], []>} : vector<16x128xbf16>, vector<128x128xbf16>, vector<16x128xf32> -> vector<16x128xf32>
    %30 = arith.addf %29, %13 : vector<16x128xf32>
    %c0_16 = arith.constant 0 : index
    %c0_17 = arith.constant 0 : index
    %31 = vector.load %arg2[%c0_16, %c0_17] : memref<16x128xf32, #tpu.memory_space<vmem>>, vector<16x128xf32>
    tpu.vector_store %arg2[%c0_16, %c0_17], %30 {strides = array<i32>} : memref<16x128xf32, #tpu.memory_space<vmem>>, vector<16x128xf32>,
    return
  }
}

</mosaic_0001>

<bundles_post_ra>
// kernel: dqn_forward.1
= control target key start
LH: loop header
LB: loop body
LE: loop exit
PB: predicated region body
PF: predicated region fallthrough
CT: control target
= control target key end

     0   :  { %7 = vsyncpa [#allocation3], 0  ;;  %s619_s12 = smov [#allocation2]   ;;  %s620_s14 = smov 64   ;;  %s658_s0 = inlined_call_operand.vmem [shape: f32[16,144], index: 0, kind: input, shape index: {}]   ;;  %s659_s1 = inlined_call_operand.hbm [shape: bf16[592,128], index: 1, kind: input, shape index: {}]   ;;  %s660_s2 = inlined_call_operand.vmem [shape: f32[16,128], index: 2, kind: output, shape index: {}]  }
   0x1   :  { %s14_s11 = sshll.u32 %s659_s1, 4  ;;  %s16_s13 = sshll.u32 %s619_s12, 4  ;;  %s15_s11 = int_to_ptr.hbm [resolvable:$true] %s14_s11  ;;  %s17_s13 = int_to_ptr.vmem [resolvable:$true] %s16_s13 }
   0x2   :  { %s621_s15 = smov 4  }
   0x3   :  { %22 = dma.hbm_to_vmem [thread:$0]  %s15_s11, 4736, %s17_s13, [#allocation3], %s620_s14, %s620_s14, %s621_s15  }
   0x4   :  { %617 = dma.done.wait [#allocation3], 4736  }
   0x5   :  { %618 = vsyncadd [#allocation3], 4294962560  ;;  %v544_v0 = vld [vmem:[#allocation2 + $0x38] sm:$0xff]  ;;  %v543_v1 = vld [vmem:[#allocation2 + $0x30] sm:$0xff]  ;;  %vm170_vm0 = vcmask 130048  }
   0x6   :  { %174 = vmatpush.bf16.msra.mxu0 %v544_v0  ;;  %v545_v2 = vld [vmem:[#allocation2 + $0x40] sm:$0xff]  ;;  %v29_v3 = vld [vmem:[%s658_s0 + $0x8] sm:$0xff]  ;;  %v31_v4 = vld [vmem:[%s658_s0 + $0x18] sm:$0xff] }
   0x7   :  { %195 = vmatpush.bf16.msra.mxu1 %v545_v2  ;;  %v33_v5 = vpack.c.bf16 %v31_v4, %v29_v3  ;;  %v553_v6 = vld [vmem:[#allocation2 + $0x88] sm:$0xff]  ;;  %v552_v8 = vld [vmem:[#allocation2 + $0x80] sm:$0xff]  ;;  %v540_v10 = vld [vmem:[#allocation2 + $0x18] sm:$0xff] }
   0x8   :  { %v542_v7 = vld [vmem:[#allocation2 + $0x28] sm:$0xff]  ;;  %253 = vmatpush.bf16.msra.mxu2 %v553_v6  ;;  %v541_v9 = vld [vmem:[#allocation2 + $0x20] sm:$0xff]  ;;  %v539_v11 = vld [vmem:[#allocation2 + $0x10] sm:$0xff] }
   0x9   :  { %v538_v12 = vld [vmem:[#allocation2 + $0x8] sm:$0xff]  ;;  %v537_v13 = vld [vmem:[#allocation2] sm:$0xff]  ;;  %v30_v15 = vld [vmem:[%s658_s0 + $0x10] sm:$0xff] }
   0xa   :  { %175 = vmatpush.bf16.msra.mxu0 %v543_v1  ;;  %440 = vmatmul.msk.bf16.vlgmr.msra.gmra.mxu1 %vm170_vm0, %v33_v5  ;;  %v28_v14 = vld [vmem:[%s658_s0] sm:$0xff]  ;;  %v551_v17 = vld [vmem:[#allocation2 + $0x78] sm:$0xff]  ;;  %v550_v18 = vld [vmem:[#allocation2 + $0x70] sm:$0xff] }
   0xb   :  { %v32_v16 = vpack.c.bf16 %v30_v15, %v28_v14  ;;  %v549_v19 = vld [vmem:[#allocation2 + $0x68] sm:$0xff]  ;;  %v548_v20 = vld [vmem:[#allocation2 + $0x60] sm:$0xff]  ;;  %v547_v21 = vld [vmem:[#allocation2 + $0x58] sm:$0xff] }
   0xc   :  { %254 = vmatpush.bf16.msra.mxu2 %v552_v8  ;;  %v546_v22 = vld [vmem:[#allocation2 + $0x50] sm:$0xff]  ;;  %v560_v24 = vld [vmem:[#allocation2 + $0xc8] sm:$0xff]  ;;  %v559_v25 = vld [vmem:[#allocation2 + $0xc0] sm:$0xff] }
   0xd   :  { %v561_v23 = vld [vmem:[#allocation2 + $0xd0] sm:$0xff]  ;;  %v558_v26 = vld [vmem:[#allocation2 + $0xb8] sm:$0xff]  ;;  %v586_v27 = vld [vmem:[#allocation2 + $0x48] sm:$0xff]  }
   0xe   :  { %176 = vmatpush.bf16.msra.mxu0 %v542_v7  ;;  %318 = vmatpush.bf16.msra.mxu3 %v561_v23  ;;  %v572_v30 = vunpack.c.l.bf16 %v586_v27  ;;  %v573_v32 = vunpack.c.h.bf16 %v586_v27  ;;  %v557_v41 = vld [vmem:[#allocation2 + $0xb0] sm:$0xff]  ;;  %v556_v42 = vld [vmem:[#allocation2 + $0xa8] sm:$0xff]  ;;  %v555_v43 = vld [vmem:[#allocation2 + $0xa0] sm:$0xff] }
   0xf   :  { %v554_v44 = vld [vmem:[#allocation2 + $0x98] sm:$0xff]  ;;  %v568_v46 = vld [vmem:[#allocation2 + $0x110] sm:$0xff]  ;;  %v567_v47 = vld [vmem:[#allocation2 + $0x108] sm:$0xff] }
  0x10   :  { %255 = vmatpush.bf16.msra.mxu2 %v551_v17  ;;  %v569_v45 = vld [vmem:[#allocation2 + $0x118] sm:$0xff]  ;;  %v566_v48 = vld [vmem:[#allocation2 + $0x100] sm:$0xff]  ;;  %v587_v49 = vld [vmem:[#allocation2 + $0x90] sm:$0xff]  }
  0x11   :  { %383 = vmatpush.bf16.msrb.mxu1 %v569_v45  ;;  %v576_v51 = vunpack.c.l.bf16 %v587_v49  ;;  %v577_v52 = vunpack.c.h.bf16 %v587_v49  ;;  %v565_v59 = vld [vmem:[#allocation2 + $0xf8] sm:$0xff]  ;;  %v564_v60 = vld [vmem:[#allocation2 + $0xf0] sm:$0xff]  ;;  %v563_v61 = vld [vmem:[#allocation2 + $0xe8] sm:$0xff] }
  0x12   :  { %177 = vmatpush.bf16.msra.mxu0 %v541_v9  ;;  %319 = vmatpush.bf16.msra.mxu3 %v560_v24  ;;  %v562_v62 = vld [vmem:[#allocation2 + $0xe0] sm:$0xff]  ;;  %v588_v63 = vld [vmem:[#allocation2 + $0xd8] sm:$0xff]  }
  0x13   :  { %v580_v1 = vunpack.c.l.bf16 %v588_v63  ;;  %v581_v2 = vunpack.c.h.bf16 %v588_v63  ;;  %v589_v9 = vld [vmem:[#allocation2 + $0x120] sm:$0xff]  }
  0x14   :  { %256 = vmatpush.bf16.msra.mxu2 %v550_v18 }
  0x15   :  { %384 = vmatpush.bf16.msrb.mxu1 %v568_v46 }
  0x16   :  { %178 = vmatpush.bf16.msra.mxu0 %v540_v10  ;;  %320 = vmatpush.bf16.msra.mxu3 %v559_v25  ;;  %v584_v10 = vunpack.c.l.bf16 %v589_v9 }
  0x18   :  { %257 = vmatpush.bf16.msra.mxu2 %v549_v19 }
  0x19   :  { %385 = vmatpush.bf16.msrb.mxu1 %v567_v47 }
  0x1a   :  { %179 = vmatpush.bf16.msra.mxu0 %v539_v11  ;;  %321 = vmatpush.bf16.msra.mxu3 %v558_v26 }
  0x1c   :  { %258 = vmatpush.bf16.msra.mxu2 %v548_v20 }
  0x1d   :  { %386 = vmatpush.bf16.msrb.mxu1 %v566_v48 }
  0x1e   :  { %180 = vmatpush.bf16.msra.mxu0 %v538_v12  ;;  %322 = vmatpush.bf16.msra.mxu3 %v557_v41 }
  0x20   :  { %259 = vmatpush.bf16.msra.mxu2 %v547_v21 }
  0x21   :  { %387 = vmatpush.bf16.msrb.mxu1 %v565_v59 }
  0x22   :  { %181 = vmatpush.bf16.msra.mxu0 %v537_v13  ;;  %323 = vmatpush.bf16.msra.mxu3 %v556_v42  ;;  %v585_v13 = vunpack.c.h.bf16 %v589_v9 }
  0x24   :  { %260 = vmatpush.bf16.msra.mxu2 %v546_v22 }
  0x25   :  { %182 = vmatmul.bf16.vlgmr.msra.gmra.mxu0 %v32_v16  ;;  %388 = vmatpush.bf16.msrb.mxu1 %v564_v60 }
  0x26   :  { %324 = vmatpush.bf16.msra.mxu3 %v555_v43 }
  0x29   :  { %389 = vmatpush.bf16.msrb.mxu1 %v563_v61 }
  0x2a   :  { %325 = vmatpush.bf16.msra.mxu3 %v554_v44 }
  0x2d   :  { %390 = vmatpush.bf16.msrb.mxu1 %v562_v62 }
  0x87   :  { %v197_v28 = vpop.f32.mrf.mxu1 }
  0x8f   :  { %v199_v36 = vpop.f32.mrf.mxu1 }
  0xa2   :  { %v183_v29 = vpop.f32.mrf.mxu0 }
  0xa3   :  { %v184_v31 = vadd.f32 %v572_v30, %v183_v29 }
  0xa5   :  { %v198_v34 = vadd.f32 %v197_v28, %v184_v31 }
  0xa7   :  { %v202_v38 = vmax.f32 %v198_v34, 0.0 }
  0xaa   :  { %v185_v33 = vpop.f32.mrf.mxu0 }
  0xab   :  { %v186_v35 = vadd.f32 %v573_v32, %v185_v33 }
  0xad   :  { %v200_v37 = vadd.f32 %v199_v36, %v186_v35 }
  0xaf   :  { %v203_v39 = vmax.f32 %v200_v37, 0.0 }
  0xb1   :  { %v204_v40 = vpack.c.bf16 %v203_v39, %v202_v38 }
  0xb3   :  { %261 = vmatmul.bf16.vlgmr.msra.gmra.mxu2 %v204_v40 }
 0x136   :  { %v262_v50 = vpop.f32.mrf.mxu2 }
 0x137   :  { %v263_v53 = vadd.f32 %v576_v51, %v262_v50 }
 0x139   :  { %v267_v56 = vmax.f32 %v263_v53, 0.0 }
 0x13e   :  { %v264_v54 = vpop.f32.mrf.mxu2 }
 0x13f   :  { %v265_v55 = vadd.f32 %v577_v52, %v264_v54 }
 0x141   :  { %v268_v57 = vmax.f32 %v265_v55, 0.0 }
 0x143   :  { %v269_v58 = vpack.c.bf16 %v268_v57, %v267_v56 }
 0x145   :  { %326 = vmatmul.bf16.vlgmr.msra.gmra.mxu3 %v269_v58 }
 0x1c8   :  { %v327_v0 = vpop.f32.mrf.mxu3 }
 0x1c9   :  { %v328_v3 = vadd.f32 %v580_v1, %v327_v0 }
 0x1cb   :  { %v332_v6 = vmax.f32 %v328_v3, 0.0 }
 0x1d0   :  { %v329_v4 = vpop.f32.mrf.mxu3 }
 0x1d1   :  { %v330_v5 = vadd.f32 %v581_v2, %v329_v4 }
 0x1d3   :  { %v333_v7 = vmax.f32 %v330_v5, 0.0 }
 0x1d5   :  { %v334_v8 = vpack.c.bf16 %v333_v7, %v332_v6 }
 0x1d7   :  { %391 = vmatmul.bf16.vlgmr.msrb.gmra.mxu1 %v334_v8 }
 0x254   :  { %v392_v11 = vpop.f32.mrf.mxu1 }
 0x255   :  { %v393_v12 = vadd.f32 %v584_v10, %v392_v11 }
 0x257   :  { %397 = vst [vmem:[%s660_s2] sm:$0xff] %v393_v12 }
 0x25c   :  { %v394_v14 = vpop.f32.mrf.mxu1 }
 0x25d   :  { %v395_v15 = vadd.f32 %v585_v13, %v394_v14 }
 0x25f   :  { %398 = vst [vmem:[%s660_s2 + $0x8] sm:$0xff] %v395_v15 }
 0x260   :  { %403 = vsyncpa [#allocation3], 1 }

</bundles_post_ra>
